<compile_context>
chip_gen: v7x
topology: tpu7x:2x2x1
jax: 0.10.0
libtpu: 0.0.40
codegen_flags: <defaults>
</compile_context>

<pallas_src>
import functools
import math

import jax
import jax.numpy as jnp
from jax import lax
from jax.experimental import pallas as pl
from jax.experimental.pallas import tpu as pltpu

# -----------------------------------------------------------------------------
# Module hyper-parameters (match the PyTorch script-level globals)
# -----------------------------------------------------------------------------
S = 30.0
M = 0.5
EASY_MARGIN = False
LS_EPS = 0.0

COS_M = math.cos(M)
SIN_M = math.sin(M)
TH = math.cos(math.pi - M)
MM = math.sin(math.pi - M) * M


# -----------------------------------------------------------------------------
# Kernel
# -----------------------------------------------------------------------------
def _arc_margin_kernel(out_features, label_ref, x_ref, wt_ref, out_ref):
    """One (class-tile, batch-tile) grid step.

    label_ref: [tB, 1]     int32 (VMEM)
    x_ref:     [tB, F]     bf16  (pre-normalized rows)
    wt_ref:    [1, F, tO]  bf16  (pre-normalized, pre-tiled weight tile)
    out_ref:   [tB, tO]    f32
    """
    j = pl.program_id(0)               # class-tile index (outer axis)
    t_o = out_ref.shape[1]

    # cosine = normalize(x) @ normalize(W)^T  (both pre-normalized, bf16
    # operands on the MXU, f32 accumulation).
    cosine = jnp.dot(x_ref[...], wt_ref[0],
                     preferred_element_type=jnp.float32)           # [tB, tO]

    # Label-column mask for this class tile (absolute class id == label).
    label = label_ref[...]                                         # [tB, 1]
    col = lax.broadcasted_iota(jnp.int32, cosine.shape, 1) + j * t_o
    is_label = col == label                                        # [tB, tO] bool

    if LS_EPS > 0:
        # Label smoothing makes one_hot dense -> full dense epilogue.
        one_hot = is_label.astype(jnp.float32)
        sine = jnp.sqrt(jnp.maximum(1.0 - cosine * cosine, 0.0))
        phi = cosine * COS_M - sine * SIN_M
        if EASY_MARGIN:
            phi = jnp.where(cosine > 0.0, phi, cosine)
        else:
            phi = jnp.where(cosine > TH, phi, cosine - MM)
        oh = (1.0 - LS_EPS) * one_hot + LS_EPS / out_features
        out = (oh * phi + (1.0 - oh) * cosine) * S
    else:
        # ls_eps == 0: phi only touches the label column -> per-row correction
        # with no materialized one_hot and no full-tile sqrt.
        cos_y = jnp.sum(jnp.where(is_label, cosine, 0.0),
                        axis=-1, keepdims=True)                    # [tB, 1]
        sin_y = jnp.sqrt(jnp.maximum(1.0 - cos_y * cos_y, 0.0))    # NaN-safe
        phi_y = cos_y * COS_M - sin_y * SIN_M
        if EASY_MARGIN:
            phi_y = jnp.where(cos_y > 0.0, phi_y, cos_y)
        else:
            phi_y = jnp.where(cos_y > TH, phi_y, cos_y - MM)
        out = jnp.where(is_label, phi_y, cosine) * S

    out_ref[...] = out.astype(out_ref.dtype)


# -----------------------------------------------------------------------------
# Wrapper
# -----------------------------------------------------------------------------
def _round_up(v, m):
    return ((v + m - 1) // m) * m


def _normalize_rows(a, eps=1e-12):
    """torch.nn.functional.normalize(a, dim=-1): a / max(||a||_2, eps)."""
    a = a.astype(jnp.float32)
    sumsq = jnp.sum(a * a, axis=-1, keepdims=True)
    return a * lax.rsqrt(jnp.maximum(sumsq, eps * eps))


def _pick_tiles(B, F, O, block_b, block_o, budget_bytes=40 * 1024 * 1024):
    """Pick (t_b, t_o) under a VMEM budget (double-buffered tiles + temps)."""
    t_b = min(_round_up(B, 8), _round_up(block_b, 8))
    t_o = min(_round_up(O, 128), _round_up(block_o, 128))

    def vmem_bytes(tb, to):
        w = 2 * F * to * 2          # W tile, bf16, double-buffered
        xb = 2 * tb * F * 2         # x tile, bf16
        ob = 2 * tb * to * 4        # out tile, f32
        lb = 2 * tb * 4             # label tile
        tmp = 3 * tb * to * 4       # cosine / mask / out temporaries
        return w + xb + ob + lb + tmp

    while vmem_bytes(t_b, t_o) > budget_bytes and t_o > 512:
        t_o = _round_up(t_o // 2, 128)
    while vmem_bytes(t_b, t_o) > budget_bytes and t_b > 64:
        t_b = _round_up(t_b // 2, 8)
    return t_b, t_o


def arc_margin_product(x, weight, label, *, block_b=256, block_o=2048):
    """x: [B, F] f32, weight: [O, F] f32, label: [B] int -> logits [B, O] f32."""
    B, F = x.shape
    O, F2 = weight.shape
    assert F2 == F, "weight/in_features mismatch"

    t_b, t_o = _pick_tiles(B, F, O, block_b, block_o)
    b_pad = _round_up(B, t_b)
    o_pad = _round_up(O, t_o)
    n_b = b_pad // t_b
    n_o = o_pad // t_o

    # One-time input prep (outside the hot loop):
    #   * x rows normalized once, cast to bf16 (no per-step XLU/EUP work).
    #   * W rows normalized, transposed to [F, O] (contraction on sublanes,
    #     classes lane-dense), cast to bf16, padded, and pre-tiled to
    #     [n_o, F, t_o] so each weight-tile DMA is one contiguous block.
    xn = _normalize_rows(x).astype(jnp.bfloat16)                   # [B, F]
    if b_pad != B:
        xn = jnp.pad(xn, ((0, b_pad - B), (0, 0)))
    wt = _normalize_rows(weight).T.astype(jnp.bfloat16)            # [F, O]
    if o_pad != O:
        wt = jnp.pad(wt, ((0, 0), (0, o_pad - O)))
    wt = jnp.transpose(wt.reshape(F, n_o, t_o), (1, 0, 2))         # [n_o, F, t_o]

    lbl = label.astype(jnp.int32).reshape(-1, 1)
    if b_pad != B:
        # TODO(synk): padded rows inherit label 0; their outputs are garbage
        # but are sliced off below — do not consume the unsliced buffer.
        lbl = jnp.pad(lbl, ((0, b_pad - B), (0, 0)))

    # Grid: class axis OUTER, batch axis INNER -> W^T streamed from HBM once,
    # tiny x/label tiles re-streamed per class tile.
    grid = (n_o, n_b)

    cost = pl.CostEstimate(
        flops=2 * B * O * F,
        transcendentals=0,
        bytes_accessed=F * O * 2 + B * F * 2 + B * O * 4 + B * 4,
    )

    out = pl.pallas_call(
        functools.partial(_arc_margin_kernel, O),
        out_shape=jax.ShapeDtypeStruct((b_pad, o_pad), jnp.float32),
        grid=grid,
        in_specs=[
            pl.BlockSpec((t_b, 1), lambda j, i: (i, 0)),      # label
            pl.BlockSpec((t_b, F), lambda j, i: (i, 0)),      # normalized x rows
            pl.BlockSpec((1, F, t_o), lambda j, i: (j, 0, 0)),  # contiguous W tile
        ],
        out_specs=pl.BlockSpec((t_b, t_o), lambda j, i: (i, j)),
        compiler_params=pltpu.CompilerParams(
            dimension_semantics=("parallel", "parallel"),
            vmem_limit_bytes=48 * 1024 * 1024,
        ),
        cost_estimate=cost,
    )(lbl, xn, wt)

    return out[:B, :O]


# -----------------------------------------------------------------------------
# References for verification
# -----------------------------------------------------------------------------
def _reference_f32(x, weight, label):
    """Pure f32 JAX port of the PyTorch forward."""
    xn = _normalize_rows(x)
    wn = _normalize_rows(weight)
    cosine = xn @ wn.T
    sine = jnp.sqrt(jnp.maximum(1.0 - cosine * cosine, 0.0))
    phi = cosine * COS_M - sine * SIN_M
    if EASY_MARGIN:
        phi = jnp.where(cosine > 0.0, phi, cosine)
    else:
        phi = jnp.where(cosine > TH, phi, cosine - MM)
    one_hot = jax.nn.one_hot(label, weight.shape[0], dtype=jnp.float32)
    if LS_EPS > 0:
        one_hot = (1.0 - LS_EPS) * one_hot + LS_EPS / weight.shape[0]
    return (one_hot * phi + (1.0 - one_hot) * cosine) * S


def _reference_bf16(x, weight, label):
    """Same math but with the kernel's bf16-operand / f32-accumulate matmul."""
    xn = _normalize_rows(x).astype(jnp.bfloat16)
    wn = _normalize_rows(weight).astype(jnp.bfloat16)
    cosine = jnp.dot(xn, wn.T, preferred_element_type=jnp.float32)
    sine = jnp.sqrt(jnp.maximum(1.0 - cosine * cosine, 0.0))
    phi = cosine * COS_M - sine * SIN_M
    if EASY_MARGIN:
        phi = jnp.where(cosine > 0.0, phi, cosine)
    else:
        phi = jnp.where(cosine > TH, phi, cosine - MM)
    one_hot = jax.nn.one_hot(label, weight.shape[0], dtype=jnp.float32)
    if LS_EPS > 0:
        one_hot = (1.0 - LS_EPS) * one_hot + LS_EPS / weight.shape[0]
    return (one_hot * phi + (1.0 - one_hot) * cosine) * S


def _xavier_uniform(key, out_features, in_features):
    limit = math.sqrt(6.0 / (in_features + out_features))
    return jax.random.uniform(key, (out_features, in_features),
                              dtype=jnp.float32, minval=-limit, maxval=limit)


if __name__ == "__main__":
    B = 8
    IN_FEATURES = 32
    OUT_FEATURES = 128

    key = jax.random.PRNGKey(0)
    k_x, k_w, k_lbl = jax.random.split(key, 3)

    x = jax.random.normal(k_x, (B, IN_FEATURES), dtype=jnp.float32)
    weight = _xavier_uniform(k_w, OUT_FEATURES, IN_FEATURES)
    label = jax.random.randint(k_lbl, (B,), 0, OUT_FEATURES, dtype=jnp.int32)

    out = jax.jit(arc_margin_product)(x, weight, label)
    out = jax.block_until_ready(out)

    assert out.shape == (B, OUT_FEATURES)
    assert not bool(jnp.any(jnp.isnan(out))), "NaN in kernel output"

    # Tight check against a reference using the same bf16-operand matmul.
    ref_bf16 = _reference_bf16(x, weight, label)
    assert jnp.allclose(out, ref_bf16, atol=2e-2, rtol=1e-3), \
        "mismatch vs bf16-matched JAX reference"

    # Loose check against the pure-f32 PyTorch-equivalent reference
    # (difference bounded by bf16 quantization of the cosine).
    ref_f32 = _reference_f32(x, weight, label)
    assert jnp.allclose(out, ref_f32, atol=0.25), \
        "mismatch vs f32 JAX reference"

    print("KERNEL_OK")
</pallas_src>

<mosaic_0001>
module attributes {stable_mosaic.version = 11 : i64} {
  func.func @_arc_margin_kernel(%arg0: i32, %arg1: i32, %arg2: memref<8x1xi32, #tpu.memory_space<vmem>>, %arg3: memref<8x32xbf16, #tpu.memory_space<vmem>>, %arg4: memref<1x32x128xbf16, #tpu.memory_space<vmem>>, %arg5: memref<8x128xf32, #tpu.memory_space<vmem>>) attributes {dimension_semantics = [#tpu.dimension_semantics<parallel>, #tpu.dimension_semantics<parallel>], iteration_bounds = array<i64: 1, 1>, scalar_prefetch = 0 : i64, scratch_operands = 0 : i64, tpu.core_type = #tpu.core_type<tc>, window_params = [{transform_indices = @transform_0, window_bounds = array<i64: 8, 1>}, {transform_indices = @transform_1, window_bounds = array<i64: 8, 32>}, {transform_indices = @transform_2, window_bounds = array<i64: 1, 32, 128>}, {transform_indices = @transform_3, window_bounds = array<i64: 8, 128>}]} {
    %c0 = arith.constant 0 : index
    %c0_0 = arith.constant 0 : index
    %0 = vector.load %arg3[%c0, %c0_0] : memref<8x32xbf16, #tpu.memory_space<vmem>>, vector<8x32xbf16>
    %c0_1 = arith.constant 0 : index
    %c0_2 = arith.constant 0 : index
    %c0_3 = arith.constant 0 : index
    %1 = vector.load %arg4[%c0_1, %c0_2, %c0_3] : memref<1x32x128xbf16, #tpu.memory_space<vmem>>, vector<1x32x128xbf16>
    %2 = vector.shape_cast %1 : vector<1x32x128xbf16> to vector<32x128xbf16>
    %cst = arith.constant dense<0.000000e+00> : vector<8x128xf32>
    %3 = tpu.matmul %0, %2, %cst {dimension_numbers = #tpu.dot_dimension_numbers<[1], [0], [0], [1], [0, 0, 1, 1], [], []>} : vector<8x32xbf16>, vector<32x128xbf16>, vector<8x128xf32> -> vector<8x128xf32>
    %c0_4 = arith.constant 0 : index
    %c0_5 = arith.constant 0 : index
    %4 = vector.load %arg2[%c0_4, %c0_5] : memref<8x1xi32, #tpu.memory_space<vmem>>, vector<8x1xi32>
    %5 = tpu.iota {dimensions = array<i32: 1>} : vector<8x128xi32>
    %c128_i32 = arith.constant 128 : i32
    %6 = arith.muli %arg0, %c128_i32 : i32
    %7 = vector.broadcast %6 : i32 to vector<8x128xi32>
    %8 = arith.addi %5, %7 : vector<8x128xi32>
    %9 = vector.broadcast %4 : vector<8x1xi32> to vector<8x128xi32>
    %10 = arith.cmpi eq, %8, %9 : vector<8x128xi32>
    %cst_6 = arith.constant 0.000000e+00 : f32
    %11 = vector.broadcast %cst_6 : f32 to vector<8x128xf32>
    %12 = arith.select %10, %3, %11 : vector<8x128xi1>, vector<8x128xf32>
    %cst_7 = arith.constant dense<0.000000e+00> : vector<8xf32>
    %13 = vector.multi_reduction <add>, %12, %cst_7 [1] : vector<8x128xf32> to vector<8xf32>
    %14 = vector.shape_cast %13 : vector<8xf32> to vector<8x1xf32>
    %15 = arith.mulf %14, %14 : vector<8x1xf32>
    %cst_8 = arith.constant 1.000000e+00 : f32
    %16 = vector.broadcast %cst_8 : f32 to vector<8x1xf32>
    %17 = arith.subf %16, %15 : vector<8x1xf32>
    %cst_9 = arith.constant 0.000000e+00 : f32
    %18 = vector.broadcast %cst_9 : f32 to vector<8x1xf32>
    %19 = arith.maximumf %17, %18 : vector<8x1xf32>
    %20 = math.sqrt %19 : vector<8x1xf32>
    %cst_10 = arith.constant 0.87758255 : f32
    %21 = vector.broadcast %cst_10 : f32 to vector<8x1xf32>
    %22 = arith.mulf %14, %21 : vector<8x1xf32>
    %cst_11 = arith.constant 0.47942555 : f32
    %23 = vector.broadcast %cst_11 : f32 to vector<8x1xf32>
    %24 = arith.mulf %20, %23 : vector<8x1xf32>
    %25 = arith.subf %22, %24 : vector<8x1xf32>
    %cst_12 = arith.constant -0.87758255 : f32
    %26 = vector.broadcast %cst_12 : f32 to vector<8x1xf32>
    %27 = arith.cmpf ogt, %14, %26 : vector<8x1xf32>
    %cst_13 = arith.constant 0.239712775 : f32
    %28 = vector.broadcast %cst_13 : f32 to vector<8x1xf32>
    %29 = arith.subf %14, %28 : vector<8x1xf32>
    %30 = arith.select %27, %25, %29 : vector<8x1xi1>, vector<8x1xf32>
    %31 = vector.shape_cast %30 : vector<8x1xf32> to vector<8x1xf32>
    %32 = vector.broadcast %31 : vector<8x1xf32> to vector<8x128xf32>
    %33 = arith.select %10, %32, %3 : vector<8x128xi1>, vector<8x128xf32>
    %cst_14 = arith.constant 3.000000e+01 : f32
    %34 = vector.broadcast %cst_14 : f32 to vector<8x128xf32>
    %35 = arith.mulf %33, %34 : vector<8x128xf32>
    %c0_15 = arith.constant 0 : index
    %c0_16 = arith.constant 0 : index
    %36 = vector.load %arg5[%c0_15, %c0_16] : memref<8x128xf32, #tpu.memory_space<vmem>>, vector<8x128xf32>
    tpu.vector_store %arg5[%c0_15, %c0_16], %35 {strides = array<i32>} : memref<8x128xf32, #tpu.memory_space<vmem>>, vector<8x128xf32>,
    return
  }
  func.func @transform_0(%arg0: i32, %arg1: i32) -> (i32, i32) {
    %c0_i32 = arith.constant 0 : i32
    %c0_i32_0 = arith.constant 0 : i32
    return %arg1, %c0_i32 : i32, i32
  }
  func.func @transform_1(%arg0: i32, %arg1: i32) -> (i32, i32) {
    %c0_i32 = arith.constant 0 : i32
    %c0_i32_0 = arith.constant 0 : i32
    return %arg1, %c0_i32 : i32, i32
  }
  func.func @transform_2(%arg0: i32, %arg1: i32) -> (i32, i32, i32) {
    %c0_i32 = arith.constant 0 : i32
    %c0_i32_0 = arith.constant 0 : i32
    %c0_i32_1 = arith.constant 0 : i32
    return %arg0, %c0_i32, %c0_i32_0 : i32, i32, i32
  }
  func.func @transform_3(%arg0: i32, %arg1: i32) -> (i32, i32) {
    %c0_i32 = arith.constant 0 : i32
    return %arg1, %arg0 : i32, i32
  }
}

</mosaic_0001>

<bundles_post_ra>
// kernel: arc_margin_product.1
= control target key start
LH: loop header
LB: loop body
LE: loop exit
PB: predicated region body
PF: predicated region fallthrough
CT: control target
= control target key end

     0   :  { %v171_v1 = vmov 0.0   ;;  %vm172_vm0 = vmmov 0   ;;  %v173_v4 = vmov 0   ;;  %s221_s0 = inlined_call_operand.vmem [shape: s32[8,1], index: 0, kind: input, shape index: {}]   ;;  %s222_s1 = inlined_call_operand.vmem [shape: bf16[8,32], index: 1, kind: input, shape index: {}]   ;;  %s223_s2 = inlined_call_operand.vmem [shape: bf16[1,32,128], index: 2, kind: input, shape index: {}]   ;;  %s224_s3 = inlined_call_operand.hbm [shape: f32[8,128], index: 3, kind: output, shape index: {}]  }
   0x1   :  { %v143_v0 = vld [vmem:[%s223_s2] sm:$0xff]   ;;  %130 = vmatprep.subr.bf16.mxu0 %v171_v1  ;;  %v144_v2 = vld [vmem:[%s223_s2 + $0x8] sm:$0xff]   ;;  %134 = vmatprep.mubr.msk.bf16.mxu0 %vm172_vm0, %v171_v1 }
   0x2   :  { %131 = vmatpush3.bf16.msra.mxu0 %v143_v0  ;;  %v77_v3 = vld [vmem:[%s221_s0] sm:$0xff]  ;;  %142 = vset.pattern.permute.xlu0 %v173_v4 }
   0x3   :  { %132 = vmatprep.subr.bf16.mxu0 %v171_v1 }
   0x4   :  { %8 = vsyncpa [#allocation3], 0  ;;  %84 = vperm.xlu0 %142, %v77_v3   ;;  %v16_v5 = vld [vmem:[%s222_s1] sm:$0xf]  ;;  %vm33_vm1 = vcmask 261120   ;;  %v78_v6 = vlaneseq  ;;  %s174_s0 = smov [#allocation2]  }
   0x5   :  { %s115_s1 = sshll.u32 %s174_s0, 4  ;;  %s116_s1 = int_to_ptr.vmem [resolvable:$true] %s115_s1 }
   0x6   :  { %133 = vmatpush3.bf16.msra.mxu0 %v144_v2  ;;  %v79_v7 = vand.u32 127, %v78_v6  ;;  %s147_s2 = scalar_lea.vmem %s116_s1, 128  ;;  %p152_p1 = scmp.lt.s32.totalorder %s116_s1, %s116_s1 }
   0x7   :  { %p148_p0 = scmp.ne.s32.totalorder %s116_s1, %s147_s2  ;;  %p153_p2 = scmp.lt.s32.totalorder %s147_s2, %s147_s2 }
   0x9   :  { %135 = vmatmul.mubr.msk.bf16.vlgmr.msra.gmra.mrb[0].mxu0 %vm33_vm1, %v16_v5  ;;  %p154_p3 = por %p153_p2, %p152_p1 }
   0xb   :  { %p155_p4 = pnand %p154_p3, %p148_p0 }
  0x83   :  { %v85_v8 = vpop.permute.xlu0 %84 }
  0x84   :  { %vm86_vm2 = vcmp.eq.s32.totalorder %v79_v7, %v85_v8 }
  0xdc   :  { %v71_v9 = vpop.f32.mrb[0].mxu0 }
  0xdd   :  { %v136_v10 = vpop.f32.mrb[1].mxu0  ;;  %v87_v11 = vsel %vm86_vm2, %v71_v9, 0.0 }
  0xde   :  { %88 = vadd.xlane.f32.xlu0 %v87_v11  ;;  %v74_v12 = vpop.f32.mrb[2].mxu0 }
  0xdf   :  { %v137_v13 = vpop.f32.mrb[3].mxu0 }
 0x16b   :  { %v89_v14 = vpop.xlane.xlu0 %88 }
 0x16c   :  { %v90_v15 = vmul.f32 %v89_v14, %v89_v14  ;;  %v100_v23 = vmul.f32 0.87758255, %v89_v14  ;;  %v126_v26 = vadd.f32 -0.23971277, %v89_v14  ;;  %vm103_vm5 = vcmp.gt.f32.partialorder %v89_v14, -0.87758255 }
 0x16e   :  { %v91_v16 = vsub.f32 1.0, %v90_v15 }
 0x170   :  { %v92_v17 = vmax.f32 %v91_v16, 0.0 }
 0x172   :  { %145 = vrsqrt.f32 %v92_v17  ;;  %vm95_vm3 = vcmp.eq.f32.partialorder %v92_v17, inf  ;;  %v98_v20 = vand.u32 2147483648, %v92_v17  ;;  %vm97_vm4 = vcmp.eq.f32.partialorder %v92_v17, 0.0 }
 0x17c   :  { %v146_v18 = vpop.eup %145 }
 0x17d   :  { %v94_v19 = vmul.f32 %v146_v18, %v92_v17 }
 0x17f   :  { %v96_v21 = vsel %vm95_vm3, %v92_v17, %v94_v19 }
 0x180   :  { %v99_v22 = vsel %vm97_vm4, %v98_v20, %v96_v21 }
 0x181   :  { %v101_v24 = vmul.f32 0.47942555, %v99_v22 }
 0x183   :  { %v102_v25 = vsub.f32 %v100_v23, %v101_v24 }
 0x185   :  { %v105_v27 = vsel %vm103_vm5, %v102_v25, %v126_v26 }
 0x186   :  { %v106_v28 = vsel %vm86_vm2, %v105_v27, %v71_v9 }
 0x187   :  { %v107_v29 = vmul.f32 30.0, %v106_v28 }
 0x189   :  { %108 = vst [vmem:[#allocation2] sm:$0xff] %v107_v29 }
 0x18a   :  { %158 = shalt.err (!%p155_p4)
}
 0x18b   :  { %s159_s22 = scalar_lea.hbm %s224_s3, 128 }
 0x18c   :  { %p160_p5 = scmp.ne.s32.totalorder %s224_s3, %s159_s22  ;;  %p163_p6 = scmp.lt.u32.totalorder %s159_s22, %s224_s3 }
 0x18e   :  { %p165_p7 = pnand %p163_p6, %p160_p5 }
 0x190   :  { %168 = shalt.err (!%p165_p7)
}
 0x191   :  { %118 = dma.vmem_to_hbm [thread:$0]  %s116_s1, 128, %s224_s3, [#allocation3]  }
 0x192   :  { %169 = dma.done.wait [#allocation3], 128  }
 0x193   :  { %170 = vsyncadd [#allocation3], 4294967168 }
 0x194   :  { %122 = vsyncpa [#allocation3], 1 }

</bundles_post_ra>
